<compile_context>
chip_gen: v6e
topology: v6e:2x2x1
jax: 0.10.0
libtpu: 0.0.40
codegen_flags: <defaults>
</compile_context>

<pallas_src>
import jax
import jax.numpy as jnp
from jax.experimental import pallas as pl
from jax.experimental.pallas import tpu as pltpu


_VMEM = pl.BlockSpec(memory_space=pltpu.MemorySpace.VMEM)
_PAD_LOGIT = -30.0          # sigmoid(-30) ~ 9e-14 -> padded points contribute ~0


# ----------------------------------------------------------------------------
# small host-side helpers
# ----------------------------------------------------------------------------
def _cdiv(a, b):
    return -(-a // b)


def _round_up(a, b):
    return _cdiv(a, b) * b


def _sublane_multiple(itemsize):
    # f32 -> 8 rows per tile, bf16 -> 16, u8 -> 32 (sub-32-bit packs along sublanes)
    return max(8, 8 * (4 // int(itemsize)))


def _padded_tile_bytes(rows, cols, itemsize):
    r = _round_up(max(int(rows), 1), _sublane_multiple(itemsize))
    c = _round_up(max(int(cols), 1), 128)
    return r * c * int(itemsize)


def _vmem_plan():
    """Generation-aware (tile budget, vmem_limit_bytes)."""
    cap = None
    try:
        info = pltpu.get_tpu_info()
        cap = int(getattr(info, "vmem_capacity_bytes", 0)) or None
    except Exception:
        cap = None
    if cap is None:
        cap = 64 * 1024 * 1024                       # conservative (v7x per-core)
    if cap >= 96 * 1024 * 1024:                      # v5e / v6e: 128 MiB physical
        return 56 * 1024 * 1024, 96 * 1024 * 1024
    return 26 * 1024 * 1024, 48 * 1024 * 1024        # v7x: 64 MiB per TensorCore


def _choose_tile_pp(qf, mk, pred_itemsize, tgt_itemsize, budget_bytes, max_tile=32768):
    """Largest point-tile (multiple of 128) whose padded, double-buffered blocks fit."""
    fixed = 2 * _padded_tile_bytes(mk, qf, pred_itemsize)      # selection matrix (2 buffers)
    fixed += 4 * _padded_tile_bytes(mk, 128, 4)                # f32 accumulators
    fixed += 2 * _padded_tile_bytes(mk, 4, 4)                  # output block
    best = 128
    t = 128
    while t <= max_tile:
        need = (fixed
                + 2 * _padded_tile_bytes(t, qf, pred_itemsize)   # pred tile, double-buffered
                + 2 * _padded_tile_bytes(mk, t, tgt_itemsize)    # target tile, double-buffered
                + 5 * _padded_tile_bytes(mk, t, 4))              # f32 in-flight intermediates
        if need > budget_bytes:
            break
        best = t
        t += 128
    return best


# ----------------------------------------------------------------------------
# Kernel 1 (fused): weighted cross-entropy (loss_labels) + L1 box loss, all
# decoder layers at once.
#   logits  [L, N, C1]   natural layout (N = B*Q), no host transpose
#   tgt_cls [L, N, 1]    int32 (out-of-range / 255 -> all-zero one-hot column)
#   class_w [1, 1, C1]
#   pbox/tbox [L, B, M, 6]   matched boxes (padded to M_max)
#   keep    [L, B, M, 1]     1.0 where matched label < 8 ("thing"), 0 for padding
# ----------------------------------------------------------------------------
def _ce_box_kernel(logits_ref, tgt_ref, w_ref, pbox_ref, tbox_ref, keep_ref,
                   ce_ref, box_ref):
    # ---- weighted cross-entropy ------------------------------------------
    logits = logits_ref[...].astype(jnp.float32)                 # (L, N, C1)
    tgt = tgt_ref[...]                                           # (L, N, 1) int32
    iota = jax.lax.broadcasted_iota(jnp.int32, logits.shape, 2)
    onehot = (iota == tgt).astype(jnp.float32)
    mx = jnp.max(logits, axis=-1, keepdims=True)
    lse = mx + jnp.log(jnp.sum(jnp.exp(logits - mx), axis=-1, keepdims=True))
    nll = -jnp.sum(onehot * (logits - lse), axis=-1, keepdims=True)   # (L, N, 1)
    w = jnp.sum(onehot * w_ref[...], axis=-1, keepdims=True)          # (L, N, 1)
    num = jnp.sum(w * nll, axis=1, keepdims=True)                     # (L, 1, 1)
    den = jnp.sum(w, axis=1, keepdims=True)
    ce_ref[...] = num / jnp.maximum(den, 1e-12)

    # ---- L1 box loss (vectorized over layers and batch) --------------------
    p = pbox_ref[...].astype(jnp.float32)                        # (L, B, M, 6)
    t = tbox_ref[...].astype(jnp.float32)
    keep = keep_ref[...].astype(jnp.float32)                     # (L, B, M, 1)
    l1 = jnp.sum(jnp.abs(p - t), axis=-1, keepdims=True) * (1.0 / p.shape[-1])
    num_b = jnp.sum(keep * l1, axis=2, keepdims=True)            # (L, B, 1, 1)
    nk = jnp.sum(keep, axis=2, keepdims=True)
    # nk == 0 -> numerator 0 -> that batch contributes 0 (matches torch)
    box_ref[...] = jnp.sum(num_b / jnp.maximum(nk, 1.0), axis=1, keepdims=True)


def _ce_box_call(logits, tcls, class_w, pbox, tbox, keep):
    n_layers = logits.shape[0]
    ce, box = pl.pallas_call(
        _ce_box_kernel,
        out_shape=(jax.ShapeDtypeStruct((n_layers, 1, 1), jnp.float32),
                   jax.ShapeDtypeStruct((n_layers, 1, 1, 1), jnp.float32)),
        in_specs=[_VMEM] * 6,
        out_specs=(_VMEM, _VMEM),
    )(logits, tcls, class_w, pbox, tbox, keep)
    return ce.reshape(n_layers), box.reshape(n_layers, 1)


# ----------------------------------------------------------------------------
# Kernel 2: per-mask BCE / dice partial sums (loss_masks), gridded over
# (layers*batch, point-tiles).
#   sel  [G, Mk, Qf]   block-structured one-hot selection (Mk = M_max*k, Qf = k*Q)
#   pred [G, Pf, Qf]   lane-dense view of pred_masks (no host gather/transpose)
#   tgt  [G, Mk, Pf]   matched + scrambled target masks (uint8 for binary masks)
# Output stats [G, Mk, 4] = per-row sums of (bce, sigmoid*tgt, sigmoid, tgt).
# ----------------------------------------------------------------------------
def _mask_stats_kernel(sel_ref, pred_ref, tgt_ref, out_ref,
                       bce_acc, prod_acc, s_acc, t_acc):
    pi = pl.program_id(1)

    @pl.when(pi == 0)
    def _init():
        bce_acc[...] = jnp.zeros_like(bce_acc)
        prod_acc[...] = jnp.zeros_like(prod_acc)
        s_acc[...] = jnp.zeros_like(s_acc)
        t_acc[...] = jnp.zeros_like(t_acc)

    sel = sel_ref[...]                              # (Mk, Qf), pred dtype
    pred = pred_ref[...]                            # (T, Qf)
    tgt = tgt_ref[...].astype(jnp.float32)          # (Mk, T)

    # matched-query gather + transpose in one MXU contraction:
    #   x[row, p] = pred[p, selected query]
    x = jax.lax.dot_general(sel, pred, (((1,), (1,)), ((), ())),
                            preferred_element_type=jnp.float32)     # (Mk, T)

    # single exp per element feeds both the stable BCE softplus and the sigmoid
    e = jnp.exp(-jnp.abs(x))
    bce = jnp.maximum(x, 0.0) - x * tgt + jnp.log(1.0 + e)
    inv_1pe = pl.reciprocal(1.0 + e, approx=False)
    s = jnp.where(x >= 0.0, inv_1pe, e * inv_1pe)                   # sigmoid(x)

    mk, t = x.shape
    nlane = t // 128

    def fold(v):
        # collapse to (Mk, 128): pure 128-aligned vreg adds, no cross-lane work
        acc = v[:, 0:128]
        for j in range(1, nlane):
            acc = acc + v[:, j * 128:(j + 1) * 128]
        return acc

    bce_acc[...] += fold(bce)
    prod_acc[...] += fold(s * tgt)
    s_acc[...] += fold(s)
    t_acc[...] += fold(tgt)

    @pl.when(pi == pl.num_programs(1) - 1)
    def _finalize():
        out_ref[...] = jnp.concatenate(
            [jnp.sum(bce_acc[...], axis=-1, keepdims=True),
             jnp.sum(prod_acc[...], axis=-1, keepdims=True),
             jnp.sum(s_acc[...], axis=-1, keepdims=True),
             jnp.sum(t_acc[...], axis=-1, keepdims=True)], axis=-1)


def _mask_stats_call(sel2, pred_f, tgt_f, *, tile_pp, vmem_limit):
    g, p_fused, qf = pred_f.shape
    _, mk, _ = sel2.shape
    n_steps = p_fused // tile_pp
    return pl.pallas_call(
        _mask_stats_kernel,
        out_shape=jax.ShapeDtypeStruct((g, mk, 4), jnp.float32),
        grid_spec=pltpu.PrefetchScalarGridSpec(
            num_scalar_prefetch=0,
            grid=(g, n_steps),
            in_specs=[
                pl.BlockSpec((None, mk, qf), lambda gi, pi: (gi, 0, 0)),        # sel
                pl.BlockSpec((None, tile_pp, qf), lambda gi, pi: (gi, pi, 0)),  # pred
                pl.BlockSpec((None, mk, tile_pp), lambda gi, pi: (gi, 0, pi)),  # tgt
            ],
            out_specs=pl.BlockSpec((None, mk, 4), lambda gi, pi: (gi, 0, 0)),
            scratch_shapes=[pltpu.VMEM((mk, 128), jnp.float32)] * 4,
        ),
        compiler_params=pltpu.CompilerParams(
            dimension_semantics=("parallel", "arbitrary"),
            vmem_limit_bytes=vmem_limit,
        ),
    )(sel2, pred_f, tgt_f)


# ----------------------------------------------------------------------------
# SetCriterion
# ----------------------------------------------------------------------------
class SetCriterion:
    def __init__(self, num_classes, matcher, weight_dict, eos_coef, losses,
                 mask_tile_pp=None, mask_pred_dtype=None):
        self.num_classes = num_classes
        self.matcher = matcher
        self.weight_dict = weight_dict
        self.eos_coef = eos_coef
        self.losses = losses
        self.mask_tile_pp = mask_tile_pp          # None -> auto-sized from the VMEM budget
        self.mask_pred_dtype = mask_pred_dtype    # e.g. jnp.bfloat16 to halve HBM traffic
        # registered buffer in PyTorch
        self.ce_class_weights = (
            jnp.ones((num_classes + 1,), jnp.float32).at[-1].set(eos_coef)
        )

    # ---------------- host-side gathers (layout plumbing only) ----------------
    def _prep_labels(self, layer_outputs, layer_indices, targets):
        n_layers = len(layer_outputs)
        if n_layers == 1:
            logits = layer_outputs[0]['pred_logits'][None]
        else:
            logits = jnp.stack([lo['pred_logits'] for lo in layer_outputs])
        logits = logits.astype(jnp.float32)                       # [L, B, Q, C1]
        _, batch, q, c1 = logits.shape
        tcls = jnp.full((n_layers, batch, q), self.num_classes, jnp.int32)
        for l in range(n_layers):
            for b in range(batch):
                src, tgt = layer_indices[l][b]
                src = jnp.asarray(src, jnp.int32)
                tgt = jnp.asarray(tgt, jnp.int32)
                if int(src.shape[0]) == 0:
                    continue
                tc = jnp.asarray(targets[b]['labels'], jnp.int32)[tgt]
                tcls = tcls.at[l, b, src].set(tc)
        return logits.reshape(n_layers, batch * q, c1), tcls.reshape(n_layers, batch * q, 1)

    def _prep_bboxs(self, layer_outputs, layer_indices, targets, m_max):
        n_layers, batch = len(layer_outputs), len(targets)
        pbox = jnp.zeros((n_layers, batch, m_max, 6), jnp.float32)
        tbox = jnp.zeros((n_layers, batch, m_max, 6), jnp.float32)
        keep = jnp.zeros((n_layers, batch, m_max, 1), jnp.float32)
        for l, lo in enumerate(layer_outputs):
            for b in range(batch):
                src, tgt = layer_indices[l][b]
                src = jnp.asarray(src, jnp.int32)
                tgt = jnp.asarray(tgt, jnp.int32)
                mb = int(src.shape[0])
                if mb == 0:
                    continue
                pbox = pbox.at[l, b, :mb].set(
                    lo['pred_bboxs'][b, src, :].astype(jnp.float32))
                tbox = tbox.at[l, b, :mb].set(
                    jnp.asarray(targets[b]['bboxs'], jnp.float32)[tgt])
                kt = (jnp.asarray(targets[b]['labels'], jnp.int32)[tgt] < 8)
                keep = keep.at[l, b, :mb, 0].set(kt.astype(jnp.float32))
        return pbox, tbox, keep

    def _prep_masks(self, layer_outputs, layer_indices, targets, m_max):
        n_layers, batch = len(layer_outputs), len(targets)
        if n_layers == 1:
            pred = layer_outputs[0]['pred_masks'][None]
        else:
            pred = jnp.stack([lo['pred_masks'] for lo in layer_outputs])     # [L, B, P, Q]
        if self.mask_pred_dtype is not None:
            pred = pred.astype(self.mask_pred_dtype)
        _, _, p_pts, q = pred.shape

        mask_dtype0 = jnp.asarray(targets[0]['masks']).dtype
        binary = (jnp.issubdtype(mask_dtype0, jnp.bool_)
                  or jnp.issubdtype(mask_dtype0, jnp.integer))
        tgt_dtype = jnp.uint8 if binary else jnp.float32          # binary masks travel as u8

        sel = jnp.zeros((n_layers, batch, m_max, q), jnp.float32)
        tmask = jnp.zeros((n_layers, batch, m_max, p_pts), tgt_dtype)
        valid = jnp.zeros((n_layers, batch, m_max), jnp.float32)
        nmask = jnp.zeros((n_layers, batch), jnp.float32)
        for l in range(n_layers):
            for b in range(batch):
                src, tgt = layer_indices[l][b]
                src = jnp.asarray(src, jnp.int32)
                tgt = jnp.asarray(tgt, jnp.int32)
                mb = int(src.shape[0])
                nmask = nmask.at[l, b].set(float(mb))
                if mb == 0:
                    continue
                sel = sel.at[l, b, :mb].set(jax.nn.one_hot(src, q, dtype=jnp.float32))
                tm = jnp.asarray(targets[b]['masks'])[tgt]
                tmask = tmask.at[l, b, :mb].set(tm.astype(tgt_dtype))
                valid = valid.at[l, b, :mb].set(1.0)
        return pred, sel, tmask, valid, nmask, p_pts, q

    # ---------------- mask / dice losses ----------------
    def _run_mask_losses(self, pred, sel, tmask, valid, nmask, p_pts, q):
        n_layers, batch = pred.shape[0], pred.shape[1]
        m_max = sel.shape[2]
        g = n_layers * batch

        # lane-dense fusion factor (k*Q = 128 when Q divides 128)
        k = 128 // q if (q <= 128 and 128 % q == 0) else 1
        qf = k * q
        mk = m_max * k

        pred = pred.reshape(g, p_pts, q)
        tmask = tmask.reshape(g, m_max, p_pts)
        sel = sel.reshape(g, m_max, q)

        budget, vmem_limit = _vmem_plan()
        tile_cap = _round_up(_cdiv(p_pts, k), 128)
        if self.mask_tile_pp is not None:
            tile = max(128, _round_up(int(self.mask_tile_pp), 128))
        else:
            tile = _choose_tile_pp(qf, mk, jnp.dtype(pred.dtype).itemsize,
                                   jnp.dtype(tmask.dtype).itemsize, budget)
        tile = min(tile, tile_cap)

        p_fused = _round_up(_cdiv(p_pts, k), tile)
        p_pad = p_fused * k
        if p_pad > p_pts:
            pred = jnp.pad(pred, ((0, 0), (0, p_pad - p_pts), (0, 0)),
                           constant_values=_PAD_LOGIT)
            tmask = jnp.pad(tmask, ((0, 0), (0, 0), (0, p_pad - p_pts)))

        pred_f = pred.reshape(g, p_fused, qf)
        tgt_f = tmask.reshape(g, m_max, p_fused, k).transpose(0, 1, 3, 2).reshape(g, mk, p_fused)
        eye = jnp.eye(k, dtype=jnp.float32)
        sel2 = jnp.einsum('rs,gmc->gmrsc', eye, sel).reshape(g, mk, qf).astype(pred.dtype)

        stats = _mask_stats_call(sel2, pred_f, tgt_f, tile_pp=tile, vmem_limit=vmem_limit)
        stats = stats.reshape(n_layers, batch, m_max, k, 4).sum(axis=3)   # per-mask sums

        nm = jnp.maximum(nmask, 1.0)                                      # [L, B]
        bce = jnp.sum(stats[..., 0] * valid, axis=-1)                     # [L, B]
        loss_mask = jnp.sum(bce / (float(p_pts) * nm), axis=-1)           # [L]
        dice = 1.0 - (2.0 * stats[..., 1] + 1.0) / (stats[..., 2] + stats[..., 3] + 1.0)
        loss_dice = jnp.sum(jnp.sum(dice * valid, axis=-1) / nm, axis=-1)  # [L]
        return loss_mask, loss_dice

    # ---------------- per-layer loss computation (2 pallas_calls total) ----------------
    def _compute_layer_losses(self, layer_outputs, layer_indices, targets, requested=None):
        requested = tuple(self.losses) if requested is None else tuple(requested)
        n_layers = len(layer_outputs)
        m_max = 1
        for idx in layer_indices:
            for src, _ in idx:
                m_max = max(m_max, int(jnp.asarray(src).shape[0]))

        out = {}
        need_labels = 'labels' in requested
        need_bboxs = 'bboxs' in requested
        if need_labels or need_bboxs:
            c1 = self.num_classes + 1
            if need_labels:
                logits, tcls = self._prep_labels(layer_outputs, layer_indices, targets)
            else:
                logits = jnp.zeros((n_layers, 1, c1), jnp.float32)
                tcls = jnp.full((n_layers, 1, 1), 255, jnp.int32)
            if need_bboxs:
                pbox, tbox, keep = self._prep_bboxs(layer_outputs, layer_indices, targets, m_max)
            else:
                pbox = jnp.zeros((n_layers, 1, 1, 6), jnp.float32)
                tbox = pbox
                keep = jnp.zeros((n_layers, 1, 1, 1), jnp.float32)
            ce, box = _ce_box_call(logits, tcls, self.ce_class_weights.reshape(1, 1, -1),
                                   pbox, tbox, keep)
            if need_labels:
                out['loss_ce'] = ce                 # [L]
            if need_bboxs:
                out['loss_box'] = box               # [L, 1] (each layer -> shape (1,))

        if 'masks' in requested:
            pred, sel, tmask, valid, nmask, p_pts, q = self._prep_masks(
                layer_outputs, layer_indices, targets, m_max)
            lm, ld = self._run_mask_losses(pred, sel, tmask, valid, nmask, p_pts, q)
            out['loss_mask'] = lm                   # [L]
            out['loss_dice'] = ld                   # [L]
        return out

    # ---------------- individual losses (API parity with the reference) ----------------
    def loss_labels(self, outputs, targets, indices):
        per = self._compute_layer_losses([outputs], [indices], targets, requested=('labels',))
        return {'loss_ce': per['loss_ce'][0]}

    def loss_bboxs(self, outputs, targets, indices):
        per = self._compute_layer_losses([outputs], [indices], targets, requested=('bboxs',))
        return {'loss_box': per['loss_box'][0]}

    def loss_masks(self, outputs, targets, indices):
        per = self._compute_layer_losses([outputs], [indices], targets, requested=('masks',))
        return {'loss_mask': per['loss_mask'][0], 'loss_dice': per['loss_dice'][0]}

    def get_loss(self, loss, outputs, targets, indices):
        loss_map = {'labels': self.loss_labels,
                    'masks': self.loss_masks,
                    'bboxs': self.loss_bboxs}
        return loss_map[loss](outputs, targets, indices)

    # ---------------- forward ----------------
    def __call__(self, outputs, targets):
        outputs_without_aux = {k: v for k, v in outputs.items() if k != 'aux_outputs'}
        layer_outputs = [outputs_without_aux]
        if 'aux_outputs' in outputs:
            layer_outputs += list(outputs['aux_outputs'])
        layer_indices = [self.matcher(lo, targets) for lo in layer_outputs]

        per_layer = self._compute_layer_losses(layer_outputs, layer_indices, targets)

        suffixes = [''] + [f'_{i}' for i in range(len(layer_outputs) - 1)]
        losses = {}
        for l, suf in enumerate(suffixes):
            for name, vals in per_layer.items():
                losses[name + suf] = vals[l]
        return losses


def identity_matcher(outputs, targets):
    """Deterministic stand-in for the Hungarian matcher: query i <-> target i."""
    out = []
    for t in targets:
        m = jnp.asarray(t['labels']).shape[0]
        idx = jnp.arange(m, dtype=jnp.int32)
        out.append((idx, idx))
    return out


if __name__ == "__main__":
    key = jax.random.PRNGKey(0)
    B, Q, P = 2, 8, 5000          # batch, queries, mask points (P not a multiple of 128)
    NUM_CLASSES = 10              # + 1 no-object class
    N_AUX = 2                     # aux decoder layers, batched into the same kernels
    M = 4                         # max targets per batch item

    def make_layer(k):
        k1, k2, k3 = jax.random.split(k, 3)
        return {
            'pred_logits': jax.random.normal(k1, (B, Q, NUM_CLASSES + 1), jnp.float32),
            'pred_masks': jax.random.normal(k2, (B, P, Q), jnp.float32),
            'pred_bboxs': jax.random.uniform(k3, (B, Q, 6), jnp.float32),
        }

    layer_keys = jax.random.split(key, N_AUX + 1)
    outputs = make_layer(layer_keys[0])
    outputs['aux_outputs'] = [make_layer(layer_keys[i + 1]) for i in range(N_AUX)]

    targets = []
    for b in range(B):
        kb = jax.random.fold_in(key, 100 + b)
        ka, kc, kd = jax.random.split(kb, 3)
        m_b = M if b == 0 else M - 1          # ragged matched-target counts
        targets.append({
            'labels': jax.random.randint(ka, (m_b,), 0, NUM_CLASSES),
            'masks': jax.random.uniform(kc, (m_b, P)) > 0.5,      # boolean -> fed as uint8
            'bboxs': jax.random.uniform(kd, (m_b, 6), jnp.float32),
        })

    weight_dict = {'loss_ce': 2.0, 'loss_mask': 5.0, 'loss_dice': 5.0, 'loss_box': 5.0}
    criterion = SetCriterion(
        NUM_CLASSES, identity_matcher, weight_dict,
        eos_coef=0.1, losses=['labels', 'masks', 'bboxs'],
        mask_tile_pp=128,                 # force a multi-step point reduction in the demo
        mask_pred_dtype=jnp.bfloat16,     # bf16 pred stream; kernel accumulates in f32
    )

    losses = criterion(outputs, targets)
    jax.block_until_ready(losses)
    print("KERNEL_OK")
</pallas_src>

<mosaic_0001>
module attributes {stable_mosaic.version = 11 : i64} {
  func.func @_ce_box_kernel(%arg0: memref<3x16x11xf32, #tpu.memory_space<vmem>>, %arg1: memref<3x16x1xi32, #tpu.memory_space<vmem>>, %arg2: memref<1x1x11xf32, #tpu.memory_space<vmem>>, %arg3: memref<3x2x4x6xf32, #tpu.memory_space<vmem>>, %arg4: memref<3x2x4x6xf32, #tpu.memory_space<vmem>>, %arg5: memref<3x2x4x1xf32, #tpu.memory_space<vmem>>, %arg6: memref<3x1x1xf32, #tpu.memory_space<vmem>>, %arg7: memref<3x1x1x1xf32, #tpu.memory_space<vmem>>) attributes {dimension_semantics = [], scalar_prefetch = 0 : i64, scratch_operands = 0 : i64, tpu.core_type = #tpu.core_type<tc>} {
    %c0 = arith.constant 0 : index
    %c0_0 = arith.constant 0 : index
    %c0_1 = arith.constant 0 : index
    %0 = vector.load %arg0[%c0, %c0_0, %c0_1] : memref<3x16x11xf32, #tpu.memory_space<vmem>>, vector<3x16x11xf32>
    %c0_2 = arith.constant 0 : index
    %c0_3 = arith.constant 0 : index
    %c0_4 = arith.constant 0 : index
    %1 = vector.load %arg1[%c0_2, %c0_3, %c0_4] : memref<3x16x1xi32, #tpu.memory_space<vmem>>, vector<3x16x1xi32>
    %2 = tpu.iota {dimensions = array<i32: 2>} : vector<3x16x11xi32>
    %3 = vector.broadcast %1 : vector<3x16x1xi32> to vector<3x16x11xi32>
    %4 = arith.cmpi eq, %2, %3 : vector<3x16x11xi32>
    %5 = arith.extui %4 : vector<3x16x11xi1> to vector<3x16x11xi32>
    %6 = arith.sitofp %5 : vector<3x16x11xi32> to vector<3x16x11xf32>
    %cst = arith.constant dense<0xFF800000> : vector<3x16xf32>
    %7 = vector.multi_reduction <maximumf>, %0, %cst [2] : vector<3x16x11xf32> to vector<3x16xf32>
    %8 = vector.shape_cast %7 : vector<3x16xf32> to vector<3x16x1xf32>
    %9 = vector.broadcast %8 : vector<3x16x1xf32> to vector<3x16x11xf32>
    %10 = arith.subf %0, %9 : vector<3x16x11xf32>
    %11 = math.exp %10 : vector<3x16x11xf32>
    %cst_5 = arith.constant dense<0.000000e+00> : vector<3x16xf32>
    %12 = vector.multi_reduction <add>, %11, %cst_5 [2] : vector<3x16x11xf32> to vector<3x16xf32>
    %13 = vector.shape_cast %12 : vector<3x16xf32> to vector<3x16x1xf32>
    %14 = math.log %13 : vector<3x16x1xf32>
    %15 = arith.addf %8, %14 : vector<3x16x1xf32>
    %16 = vector.broadcast %15 : vector<3x16x1xf32> to vector<3x16x11xf32>
    %17 = arith.subf %0, %16 : vector<3x16x11xf32>
    %18 = arith.mulf %6, %17 : vector<3x16x11xf32>
    %cst_6 = arith.constant dense<0.000000e+00> : vector<3x16xf32>
    %19 = vector.multi_reduction <add>, %18, %cst_6 [2] : vector<3x16x11xf32> to vector<3x16xf32>
    %20 = vector.shape_cast %19 : vector<3x16xf32> to vector<3x16x1xf32>
    %cst_7 = arith.constant 0.000000e+00 : f32
    %21 = vector.broadcast %cst_7 : f32 to vector<3x16x1xf32>
    %22 = arith.subf %21, %20 : vector<3x16x1xf32>
    %c0_8 = arith.constant 0 : index
    %c0_9 = arith.constant 0 : index
    %c0_10 = arith.constant 0 : index
    %23 = vector.load %arg2[%c0_8, %c0_9, %c0_10] : memref<1x1x11xf32, #tpu.memory_space<vmem>>, vector<1x1x11xf32>
    %24 = vector.broadcast %23 : vector<1x1x11xf32> to vector<3x16x11xf32>
    %25 = arith.mulf %6, %24 : vector<3x16x11xf32>
    %cst_11 = arith.constant dense<0.000000e+00> : vector<3x16xf32>
    %26 = vector.multi_reduction <add>, %25, %cst_11 [2] : vector<3x16x11xf32> to vector<3x16xf32>
    %27 = vector.shape_cast %26 : vector<3x16xf32> to vector<3x16x1xf32>
    %28 = arith.mulf %27, %22 : vector<3x16x1xf32>
    %cst_12 = arith.constant dense<0.000000e+00> : vector<3x1xf32>
    %29 = vector.multi_reduction <add>, %28, %cst_12 [1] : vector<3x16x1xf32> to vector<3x1xf32>
    %30 = vector.shape_cast %29 : vector<3x1xf32> to vector<3x1x1xf32>
    %cst_13 = arith.constant dense<0.000000e+00> : vector<3x1xf32>
    %31 = vector.multi_reduction <add>, %27, %cst_13 [1] : vector<3x16x1xf32> to vector<3x1xf32>
    %32 = vector.shape_cast %31 : vector<3x1xf32> to vector<3x1x1xf32>
    %cst_14 = arith.constant 9.99999996E-13 : f32
    %33 = vector.broadcast %cst_14 : f32 to vector<3x1x1xf32>
    %34 = arith.maximumf %32, %33 : vector<3x1x1xf32>
    %35 = arith.divf %30, %34 : vector<3x1x1xf32>
    %c0_15 = arith.constant 0 : index
    %c0_16 = arith.constant 0 : index
    %c0_17 = arith.constant 0 : index
    %36 = vector.load %arg6[%c0_15, %c0_16, %c0_17] : memref<3x1x1xf32, #tpu.memory_space<vmem>>, vector<3x1x1xf32>
    tpu.vector_store %arg6[%c0_15, %c0_16, %c0_17], %35 {strides = array<i32>} : memref<3x1x1xf32, #tpu.memory_space<vmem>>, vector<3x1x1xf32>,
    %c0_18 = arith.constant 0 : index
    %c0_19 = arith.constant 0 : index
    %c0_20 = arith.constant 0 : index
    %c0_21 = arith.constant 0 : index
    %37 = vector.load %arg3[%c0_18, %c0_19, %c0_20, %c0_21] : memref<3x2x4x6xf32, #tpu.memory_space<vmem>>, vector<3x2x4x6xf32>
    %c0_22 = arith.constant 0 : index
    %c0_23 = arith.constant 0 : index
    %c0_24 = arith.constant 0 : index
    %c0_25 = arith.constant 0 : index
    %38 = vector.load %arg4[%c0_22, %c0_23, %c0_24, %c0_25] : memref<3x2x4x6xf32, #tpu.memory_space<vmem>>, vector<3x2x4x6xf32>
    %c0_26 = arith.constant 0 : index
    %c0_27 = arith.constant 0 : index
    %c0_28 = arith.constant 0 : index
    %c0_29 = arith.constant 0 : index
    %39 = vector.load %arg5[%c0_26, %c0_27, %c0_28, %c0_29] : memref<3x2x4x1xf32, #tpu.memory_space<vmem>>, vector<3x2x4x1xf32>
    %40 = arith.subf %37, %38 : vector<3x2x4x6xf32>
    %41 = math.absf %40 : vector<3x2x4x6xf32>
    %cst_30 = arith.constant dense<0.000000e+00> : vector<3x2x4xf32>
    %42 = vector.multi_reduction <add>, %41, %cst_30 [3] : vector<3x2x4x6xf32> to vector<3x2x4xf32>
    %43 = vector.shape_cast %42 : vector<3x2x4xf32> to vector<3x2x4x1xf32>
    %cst_31 = arith.constant 0.166666672 : f32
    %44 = vector.broadcast %cst_31 : f32 to vector<3x2x4x1xf32>
    %45 = arith.mulf %43, %44 : vector<3x2x4x1xf32>
    %46 = arith.mulf %39, %45 : vector<3x2x4x1xf32>
    %cst_32 = arith.constant dense<0.000000e+00> : vector<3x2x1xf32>
    %47 = vector.multi_reduction <add>, %46, %cst_32 [2] : vector<3x2x4x1xf32> to vector<3x2x1xf32>
    %48 = vector.shape_cast %47 : vector<3x2x1xf32> to vector<3x2x1x1xf32>
    %cst_33 = arith.constant dense<0.000000e+00> : vector<3x2x1xf32>
    %49 = vector.multi_reduction <add>, %39, %cst_33 [2] : vector<3x2x4x1xf32> to vector<3x2x1xf32>
    %50 = vector.shape_cast %49 : vector<3x2x1xf32> to vector<3x2x1x1xf32>
    %cst_34 = arith.constant 1.000000e+00 : f32
    %51 = vector.broadcast %cst_34 : f32 to vector<3x2x1x1xf32>
    %52 = arith.maximumf %50, %51 : vector<3x2x1x1xf32>
    %53 = arith.divf %48, %52 : vector<3x2x1x1xf32>
    %cst_35 = arith.constant dense<0.000000e+00> : vector<3x1x1xf32>
    %54 = vector.multi_reduction <add>, %53, %cst_35 [1] : vector<3x2x1x1xf32> to vector<3x1x1xf32>
    %55 = vector.shape_cast %54 : vector<3x1x1xf32> to vector<3x1x1x1xf32>
    %c0_36 = arith.constant 0 : index
    %c0_37 = arith.constant 0 : index
    %c0_38 = arith.constant 0 : index
    %c0_39 = arith.constant 0 : index
    %56 = vector.load %arg7[%c0_36, %c0_37, %c0_38, %c0_39] : memref<3x1x1x1xf32, #tpu.memory_space<vmem>>, vector<3x1x1x1xf32>
    tpu.vector_store %arg7[%c0_36, %c0_37, %c0_38, %c0_39], %55 {strides = array<i32>} : memref<3x1x1x1xf32, #tpu.memory_space<vmem>>, vector<3x1x1x1xf32>,
    return
  }
}

</mosaic_0001>

<bundles_post_ra>
// kernel: tpu_custom_call.1
= control target key start
LH: loop header
LB: loop body
LE: loop exit
PB: predicated region body
PF: predicated region fallthrough
CT: control target
= control target key end

     0   :  { %vm75_vm0 = vcmask 89088   ;;  %v514_v12 = vmov 0   ;;  %v37_v51 = vlaneseq  ;;  %v515_v58 = vmov 0.0   ;;  %s843_s0 = inlined_call_operand.vmem [shape: f32[3,16,11], index: 0, kind: input, shape index: {}]   ;;  %s844_s1 = inlined_call_operand.vmem [shape: s32[3,16,1], index: 1, kind: input, shape index: {}]   ;;  %s845_s2 = inlined_call_operand.vmem [shape: f32[1,1,11], index: 2, kind: input, shape index: {}]   ;;  %s846_s3 = inlined_call_operand.vmem [shape: f32[3,2,4,6], index: 3, kind: input, shape index: {}]   ;;  %s847_s4 = inlined_call_operand.vmem [shape: f32[3,2,4,6], index: 4, kind: input, shape index: {}]   ;;  %s848_s5 = inlined_call_operand.vmem [shape: f32[3,2,4,1], index: 5, kind: input, shape index: {}]   ;;  %s849_s7 = inlined_call_operand.vmem [shape: f32[3,1,1,1], index: 7, kind: output, shape index: {1}]   ;;  %s850_s6 = inlined_call_operand.vmem [shape: f32[3,1,1], index: 6, kind: output, shape index: {0}]  }
   0x1   :  { %v559_v0 = vld [vmem:[%s843_s0] sm:$0xff]  ;;  %v564_v1 = vld [vmem:[%s843_s0 + $0x10] sm:$0xff]  ;;  %v569_v2 = vld [vmem:[%s843_s0 + $0x8] sm:$0xff]  ;;  %471 = vset.pattern.permute.xlu1 %v514_v12  ;;  %470 = vset.pattern.permute.xlu0 %v514_v12  ;;  %vm306_vm6 = vcmask 44032   ;;  %vm337_vm8 = vcmask 3072   ;;  %vm440_vm9 = vcmask 7168  }
   0x2   :  { %v76_v3 = vsel %vm75_vm0, %v559_v0, -inf  ;;  %v82_v4 = vsel %vm75_vm0, %v564_v1, -inf  ;;  %v578_v5 = vld [vmem:[%s843_s0 + $0x18] sm:$0xff]  ;;  %v79_v6 = vsel %vm75_vm0, %v569_v2, -inf  ;;  %v587_v8 = vld [vmem:[%s843_s0 + $0x20] sm:$0xff]  ;;  %v592_v9 = vld [vmem:[%s843_s0 + $0x28] sm:$0xff] }
   0x3   :  { %77 = vmax.xlane.f32.xlu0 %v76_v3  ;;  %83 = vmax.xlane.f32.xlu1 %v82_v4  ;;  %v85_v7 = vsel %vm75_vm0, %v578_v5, -inf  ;;  %v88_v10 = vsel %vm75_vm0, %v587_v8, -inf  ;;  %v91_v11 = vsel %vm75_vm0, %v592_v9, -inf  ;;  %v32_v38 = vld [vmem:[%s844_s1 + $0x8] sm:$0xff]  ;;  %v33_v39 = vld [vmem:[%s844_s1 + $0x10] sm:$0xff]  ;;  %v31_v40 = vld [vmem:[%s844_s1] sm:$0xff] }
   0x4   :  { %v34_v41 = vld [vmem:[%s844_s1 + $0x18] sm:$0xff]  ;;  %v35_v42 = vld [vmem:[%s844_s1 + $0x20] sm:$0xff]  ;;  %v36_v48 = vld [vmem:[%s844_s1 + $0x28] sm:$0xff]  ;;  %v646_v54 = vand.u32 127, %v37_v51  ;;  %vm272_vm10 = vcmask 0  }
   0x5   :  { %v651_v57 = vld [vmem:[%s845_s2] ss:$0 sm:$0xff] }
   0x7   :  { %80 = vmax.xlane.f32.xlu0 %v79_v6  ;;  %86 = vmax.xlane.f32.xlu1 %v85_v7 }
   0xb   :  { %89 = vmax.xlane.f32.xlu0 %v88_v10  ;;  %92 = vmax.xlane.f32.xlu1 %v91_v11 }
  0x8c   :  { %v598_v13 = vpop.xlane.xlu0 %77  ;;  %v600_v14 = vpop.xlane.xlu1 %83 }
  0x8d   :  { %v94_v15 = vsub.f32 %v559_v0, %v598_v13  ;;  %v96_v16 = vsub.f32 %v564_v1, %v600_v14 }
  0x8f   :  { %v100_v17 = vmul.f32 1.442695, %v94_v15  ;;  %v104_v18 = vmul.f32 1.442695, %v96_v16  ;;  %v276_v15 = vld [vmem:[%s846_s3] sm:$0xf] }
  0x90   :  { %v606_v19 = vpop.xlane.xlu0 %80  ;;  %v608_v20 = vpop.xlane.xlu1 %86  ;;  %v282_v16 = vld [vmem:[%s847_s4] sm:$0xf] }
  0x91   :  { %472 = vpow2.f32 %v100_v17  ;;  %v95_v21 = vsub.f32 %v569_v2, %v606_v19  ;;  %v97_v22 = vsub.f32 %v578_v5, %v608_v20 }
  0x92   :  { %474 = vpow2.f32 %v104_v18 }
  0x93   :  { %v102_v23 = vmul.f32 1.442695, %v95_v21  ;;  %v106_v24 = vmul.f32 1.442695, %v97_v22 }
  0x94   :  { %v614_v25 = vpop.xlane.xlu0 %89  ;;  %v638_v43 = vpop.xlane.xlu1 %92 }
  0x95   :  { %476 = vpow2.f32 %v102_v23  ;;  %v98_v26 = vsub.f32 %v587_v8, %v614_v25  ;;  %v99_v44 = vsub.f32 %v592_v9, %v638_v43 }
  0x96   :  { %478 = vpow2.f32 %v106_v24  ;;  %v294_v24 = vsub.f32 %v276_v15, %v282_v16 }
  0x97   :  { %v108_v27 = vmul.f32 1.442695, %v98_v26  ;;  %v110_v45 = vmul.f32 1.442695, %v99_v44 }
  0x99   :  { %480 = vpow2.f32 %v108_v27 }
  0x9a   :  { %482 = vpow2.f32 %v110_v45 }
  0x9e   :  { %v473_v28 = vpop.eup %472 }
  0x9f   :  { %v475_v29 = vpop.eup %474  ;;  %v112_v30 = vsel %vm75_vm0, %v473_v28, 0.0 }
  0xa0   :  { %113 = vadd.xlane.f32.xlu0 %v112_v30  ;;  %v118_v31 = vsel %vm75_vm0, %v475_v29, 0.0  ;;  %v284_v29 = vld [vmem:[%s847_s4 + $0x8] sm:$0xf] }
  0xa2   :  { %v477_v32 = vpop.eup %476 }
  0xa3   :  { %v479_v33 = vpop.eup %478  ;;  %v115_v34 = vsel %vm75_vm0, %v477_v32, 0.0 }
  0xa4   :  { %119 = vadd.xlane.f32.xlu0 %v118_v31  ;;  %116 = vadd.xlane.f32.xlu1 %v115_v34  ;;  %v121_v35 = vsel %vm75_vm0, %v479_v33, 0.0 }
  0xa6   :  { %v481_v36 = vpop.eup %480 }
  0xa7   :  { %v124_v37 = vsel %vm75_vm0, %v481_v36, 0.0  ;;  %v483_v46 = vpop.eup %482 }
  0xa8   :  { %122 = vadd.xlane.f32.xlu1 %v121_v35  ;;  %125 = vadd.xlane.f32.xlu0 %v124_v37  ;;  %v127_v47 = vsel %vm75_vm0, %v483_v46, 0.0  ;;  %v300_v35 = vand.u32 2147483647, %v294_v24 }
  0xb9   :  { %43 = vperm.xlu1 %471, %v32_v38   ;;  %v286_v38 = vld [vmem:[%s847_s4 + $0x10] sm:$0xf] }
  0xbd   :  { %46 = vperm.xlu1 %471, %v33_v39  }
  0xbe   :  { %40 = vperm.xlu0 %470, %v31_v40  }
  0xc1   :  { %49 = vperm.xlu1 %471, %v34_v41  }
  0xc5   :  { %52 = vperm.xlu1 %471, %v35_v42  }
  0xe9   :  { %128 = vadd.xlane.f32.xlu1 %v127_v47 }
  0xfa   :  { %55 = vperm.xlu1 %471, %v36_v48  }
 0x129   :  { %v114_v49 = vpop.xlane.xlu0 %113 }
 0x12d   :  { %v117_v50 = vpop.xlane.xlu1 %116  ;;  %v120_v52 = vpop.xlane.xlu0 %119 }
 0x12e   :  { %484 = vlog2.f32 %v117_v50 }
 0x131   :  { %v123_v53 = vpop.xlane.xlu1 %122  ;;  %v126_v55 = vpop.xlane.xlu0 %125 }
 0x132   :  { %486 = vlog2.f32 %v123_v53 }
 0x133   :  { %488 = vlog2.f32 %v114_v49 }
 0x134   :  { %490 = vlog2.f32 %v120_v52 }
 0x135   :  { %v44_v56 = vpop.permute.xlu1 %43  ;;  %492 = vlog2.f32 %v126_v55 }
 0x136   :  { %vm58_vm1 = vcmp.eq.s32.totalorder %v646_v54, %v44_v56 }
 0x137   :  { %v462_v59 = vsel %vm58_vm1, 1.0, %v515_v58 }
 0x138   :  { %v192_v60 = vmul.f32 %v651_v57, %v462_v59 }
 0x139   :  { %v47_v61 = vpop.permute.xlu1 %46  ;;  %v41_v62 = vpop.permute.xlu0 %40 }
 0x13a   :  { %vm59_vm2 = vcmp.eq.s32.totalorder %v646_v54, %v47_v61  ;;  %vm57_vm3 = vcmp.eq.s32.totalorder %v646_v54, %v41_v62  ;;  %v200_v63 = vsel %vm75_vm0, %v192_v60, 0.0 }
 0x13b   :  { %v485_v3 = vpop.eup %484  ;;  %v660_v4 = vsel %vm59_vm2, 1.0, %v515_v58  ;;  %v461_v6 = vsel %vm57_vm3, 1.0, %v515_v58  ;;  %201 = vadd.xlane.f32.xlu0 %v200_v63 }
 0x13c   :  { %v133_v7 = vmul.f32 0.6931472, %v485_v3  ;;  %v191_v10 = vmul.f32 %v651_v57, %v461_v6  ;;  %v193_v12 = vmul.f32 %v651_v57, %v660_v4 }
 0x13d   :  { %v50_v11 = vpop.permute.xlu1 %49 }
 0x13e   :  { %v143_v17 = vadd.f32 %v133_v7, %v606_v19  ;;  %vm60_vm4 = vcmp.eq.s32.totalorder %v646_v54, %v50_v11  ;;  %v197_v18 = vsel %vm75_vm0, %v191_v10, 0.0  ;;  %v203_v28 = vsel %vm75_vm0, %v193_v12, 0.0  ;;  %v278_v19 = vld [vmem:[%s846_s3 + $0x8] sm:$0xf]  ;;  %v285_v10 = vld [vmem:[%s847_s4 + $0xc] sm:$0xf] }
 0x13f   :  { %v487_v21 = vpop.eup %486  ;;  %v464_v22 = vsel %vm60_vm4, 1.0, %v515_v58  ;;  %198 = vadd.xlane.f32.xlu1 %v197_v18  ;;  %v296_v36 = vsub.f32 %v278_v19, %v284_v29  ;;  %v287_v18 = vld [vmem:[%s847_s4 + $0x14] sm:$0xf] }
 0x140   :  { %v137_v23 = vmul.f32 0.6931472, %v487_v21  ;;  %v149_v26 = vsub.f32 %v569_v2, %v143_v17  ;;  %v194_v31 = vmul.f32 %v651_v57, %v464_v22  ;;  %v489_v2 = vpop.eup %488  ;;  %v281_v17 = vld [vmem:[%s846_s3 + $0x14] sm:$0xf] }
 0x141   :  { %v53_v27 = vpop.permute.xlu1 %52  ;;  %v131_v39 = vmul.f32 0.6931472, %v489_v2  ;;  %v491_v44 = vpop.eup %490  ;;  %v302_v45 = vand.u32 2147483647, %v296_v36 }
 0x142   :  { %v145_v30 = vadd.f32 %v137_v23, %v608_v20  ;;  %vm61_vm5 = vcmp.eq.s32.totalorder %v646_v54, %v53_v27  ;;  %v687_v32 = vmul.f32 %v462_v59, %v149_v26  ;;  %v280_v20 = vld [vmem:[%s846_s3 + $0x10] sm:$0xf]  ;;  %v206_v41 = vsel %vm75_vm0, %v194_v31, 0.0  ;;  %v493_v49 = vpop.eup %492 }
 0x143   :  { %v465_v33 = vsel %vm61_vm5, 1.0, %v515_v58  ;;  %204 = vadd.xlane.f32.xlu1 %v203_v28  ;;  %v298_v46 = vsub.f32 %v280_v20, %v286_v38  ;;  %v142_v47 = vadd.f32 %v131_v39, %v598_v13  ;;  %v135_v48 = vmul.f32 0.6931472, %v491_v44  ;;  %v771_v39 = vld [vmem:[%s848_s5 + $0xc] sm:$0xf] }
 0x144   :  { %v195_v34 = vmul.f32 %v651_v57, %v465_v33  ;;  %v151_v37 = vsub.f32 %v578_v5, %v145_v30  ;;  %v307_v5 = vsel %vm306_vm6, %v300_v35, 0.0  ;;  %v313_v50 = vsel %vm306_vm6, %v302_v45, 0.0  ;;  %v292_v44 = vld [vmem:[%s848_s5 + $0x10] sm:$0xf] }
 0x145   :  { %v304_v51 = vand.u32 2147483647, %v298_v46  ;;  %v144_v52 = vadd.f32 %v135_v48, %v600_v14  ;;  %v139_v53 = vmul.f32 0.6931472, %v493_v49  ;;  %v148_v55 = vsub.f32 %v559_v0, %v142_v47  ;;  %v783_v47 = vld [vmem:[%s848_s5 + $0x14] sm:$0xf] }
 0x146   :  { %v209_v40 = vsel %vm75_vm0, %v195_v34, 0.0  ;;  %v700_v42 = vmul.f32 %v464_v22, %v151_v37  ;;  %v299_v23 = vsub.f32 %v281_v17, %v287_v18  ;;  %v163_v19 = vsel %vm75_vm0, %v687_v32, 0.0  ;;  %v290_v37 = vld [vmem:[%s848_s5 + $0x8] sm:$0xf] }
 0x147   :  { %210 = vadd.xlane.f32.xlu0 %v209_v40  ;;  %207 = vadd.xlane.f32.xlu1 %v206_v41  ;;  %v319_v56 = vsel %vm306_vm6, %v304_v51, 0.0  ;;  %v146_v59 = vadd.f32 %v139_v53, %v614_v25  ;;  %v154_v60 = vmul.f32 %v461_v6, %v148_v55  ;;  %v150_v61 = vsub.f32 %v564_v1, %v144_v52  ;;  %v277_v1 = vld [vmem:[%s846_s3 + $0x4] sm:$0xf]  ;;  %v279_v6 = vld [vmem:[%s846_s3 + $0xc] sm:$0xf] }
 0x148   :  { %v283_v25 = vld [vmem:[%s847_s4 + $0x4] sm:$0xf]  ;;  %v297_v16 = vsub.f32 %v279_v6, %v285_v10  ;;  %v305_v24 = vand.u32 2147483647, %v299_v23  ;;  %v169_v30 = vsel %vm75_vm0, %v700_v42, 0.0  ;;  %v394_v38 = vsel %vm337_vm8, %v290_v37, 0.0 }
 0x149   :  { %v160_v13 = vsel %vm75_vm0, %v154_v60, 0.0  ;;  %v156_v62 = vmul.f32 %v660_v4, %v150_v61  ;;  %v152_v63 = vsub.f32 %v587_v8, %v146_v59  ;;  %v295_v4 = vsub.f32 %v277_v1, %v283_v25 }
 0x14a   :  { %v322_v27 = vsel %vm306_vm6, %v305_v24, 0.0  ;;  %v395_v45 = vrot.slane %v394_v38, 4  ;;  %v401_v46 = vsel %vm337_vm8, %v771_v39, 0.0  ;;  %v408_v49 = vsel %vm337_vm8, %v292_v44, 0.0 }
 0x14b   :  { %308 = vadd.xlane.f32.xlu0 %v307_v5  ;;  %v166_v14 = vsel %vm75_vm0, %v156_v62, 0.0  ;;  %v158_v3 = vmul.f32 %v465_v33, %v152_v63  ;;  %v301_v15 = vand.u32 2147483647, %v295_v4  ;;  %v288_v33 = vld [vmem:[%s848_s5] sm:$0xf]  ;;  %v402_v52 = vrot.slane %v401_v46, 4 }
 0x14c   :  { %v380_v32 = vsel %vm337_vm8, %v288_v33, 0.0  ;;  %v396_v55 = vadd.f32 %v395_v45, %v394_v38  ;;  %v409_v60 = vrot.slane %v408_v49, 4 }
 0x14d   :  { %v172_v0 = vsel %vm75_vm0, %v158_v3, 0.0  ;;  %v310_v22 = vsel %vm306_vm6, %v301_v15, 0.0  ;;  %v381_v36 = vrot.slane %v380_v32, 4  ;;  %v403_v3 = vadd.f32 %v402_v52, %v401_v46 }
 0x14e   :  { %v410_v4 = vadd.f32 %v409_v60, %v408_v49 }
 0x14f   :  { %314 = vadd.xlane.f32.xlu0 %v313_v50  ;;  %v382_v41 = vadd.f32 %v381_v36, %v380_v32 }
 0x151   :  { %v383_v48 = vrot.slane %v382_v41, 2 }
 0x153   :  { %320 = vadd.xlane.f32.xlu0 %v319_v56  ;;  %v415_v56 = vsel %vm337_vm8, %v783_v47, 0.0  ;;  %v384_v61 = vadd.f32 %v383_v48, %v382_v41 }
 0x157   :  { %161 = vadd.xlane.f32.xlu0 %v160_v13 }
 0x15b   :  { %167 = vadd.xlane.f32.xlu0 %v166_v14 }
 0x15f   :  { %173 = vadd.xlane.f32.xlu0 %v172_v0  ;;  %v416_v0 = vrot.slane %v415_v56, 4 }
 0x161   :  { %v417_v15 = vadd.f32 %v416_v0, %v415_v56 }
 0x172   :  { %v129_v7 = vpop.xlane.xlu1 %128 }
 0x173   :  { %494 = vlog2.f32 %v129_v7  ;;  %v397_v7 = vrot.slane %v396_v55, 2 }
 0x176   :  { %v56_v8 = vpop.permute.xlu1 %55 }
 0x177   :  { %vm62_vm7 = vcmp.eq.s32.totalorder %v646_v54, %v56_v8  ;;  %v303_v54 = vand.u32 2147483647, %v297_v16  ;;  %v385_v8 = vrot.slane %v384_v61, 1  ;;  %v398_v16 = vadd.f32 %v397_v7, %v396_v55 }
 0x178   :  { %v466_v11 = vsel %vm62_vm7, 1.0, %v515_v58 }
 0x179   :  { %v196_v12 = vmul.f32 %v651_v57, %v466_v11  ;;  %v316_v57 = vsel %vm306_vm6, %v303_v54, 0.0  ;;  %v386_v23 = vadd.f32 %v385_v8, %v384_v61 }
 0x17b   :  { %v212_v21 = vsel %vm75_vm0, %v196_v12, 0.0  ;;  %v404_v12 = vrot.slane %v403_v3, 2 }
 0x17c   :  { %213 = vadd.xlane.f32.xlu1 %v212_v21 }
 0x180   :  { %v495_v58 = vpop.eup %494  ;;  %311 = vadd.xlane.f32.xlu1 %v310_v22  ;;  %v411_v22 = vrot.slane %v410_v4, 2 }
 0x181   :  { %v141_v26 = vmul.f32 0.6931472, %v495_v58 }
 0x183   :  { %v147_v28 = vadd.f32 %v141_v26, %v638_v43  ;;  %v405_v26 = vadd.f32 %v404_v12, %v403_v3 }
 0x184   :  { %317 = vadd.xlane.f32.xlu1 %v316_v57 }
 0x185   :  { %v153_v29 = vsub.f32 %v592_v9, %v147_v28  ;;  %v758_v9 = vld [vmem:[%s848_s5 + $0x4] sm:$0xf]  ;;  %v399_v28 = vrot.slane %v398_v16, 1 }
 0x186   :  { %v387_v20 = vsel %vm337_vm8, %v758_v9, 0.0 }
 0x187   :  { %v159_v31 = vmul.f32 %v466_v11, %v153_v29  ;;  %v388_v42 = vrot.slane %v387_v20, 4  ;;  %v400_v38 = vadd.f32 %v399_v28, %v398_v16 }
 0x188   :  { %323 = vadd.xlane.f32.xlu1 %v322_v27  ;;  %v418_v27 = vrot.slane %v417_v15, 2 }
 0x189   :  { %v175_v2 = vsel %vm75_vm0, %v159_v31, 0.0  ;;  %v389_v50 = vadd.f32 %v388_v42, %v387_v20  ;;  %v406_v20 = vrot.slane %v405_v26, 1  ;;  %v424_v55 = vmax.f32 %v400_v38, 1.0 }
 0x18b   :  { %v390_v62 = vrot.slane %v389_v50, 2 }
 0x18c   :  { %164 = vadd.xlane.f32.xlu1 %v163_v19 }
 0x18d   :  { %v391_v6 = vadd.f32 %v390_v62, %v389_v50 }
 0x18f   :  { %v392_v24 = vrot.slane %v391_v6, 1 }
 0x190   :  { %170 = vadd.xlane.f32.xlu1 %v169_v30  ;;  %v412_v30 = vadd.f32 %v411_v22, %v410_v4 }
 0x191   :  { %v393_v36 = vadd.f32 %v392_v24, %v391_v6 }
 0x193   :  { %v423_v50 = vmax.f32 %v393_v36, 1.0 }
 0x194   :  { %176 = vadd.xlane.f32.xlu1 %v175_v2  ;;  %v422_v2 = vmax.f32 %v386_v23, 1.0 }
 0x196   :  { %496 = vrcp.f32 %v422_v2 }
 0x197   :  { %498 = vrcp.f32 %v423_v50 }
 0x198   :  { %500 = vrcp.f32 %v424_v55 }
 0x1c4   :  { %v750_v43 = vpop.xlane.xlu0 %201 }
 0x1c8   :  { %v753_v34 = vpop.xlane.xlu1 %198 }
 0x1c9   :  { %v242_v59 = vadd.f32 %v750_v43, %v753_v34 }
 0x1cb   :  { %v243_v1 = vrot.slane %v242_v59, 4 }
 0x1cc   :  { %v773_v40 = vpop.xlane.xlu1 %204 }
 0x1cd   :  { %v244_v18 = vadd.f32 %v243_v1, %v242_v59 }
 0x1cf   :  { %v245_v19 = vrot.slane %v244_v18, 2 }
 0x1d0   :  { %v760_v35 = vpop.xlane.xlu0 %210  ;;  %v786_v53 = vpop.xlane.xlu1 %207 }
 0x1d1   :  { %v249_v63 = vadd.f32 %v786_v53, %v773_v40  ;;  %v246_v42 = vadd.f32 %v245_v19, %v244_v18 }
 0x1d3   :  { %v250_v10 = vrot.slane %v249_v63, 4  ;;  %v247_v61 = vrot.slane %v246_v42, 1 }
 0x1d4   :  { %v309_v5 = vpop.xlane.xlu0 %308 }
 0x1d5   :  { %v325_v51 = vmul.f32 0.16666667, %v309_v5  ;;  %v251_v57 = vadd.f32 %v250_v10, %v249_v63  ;;  %v413_v5 = vrot.slane %v412_v30, 1  ;;  %v248_v10 = vadd.f32 %v247_v61, %v246_v42 }
 0x1d7   :  { %v331_v14 = vmul.f32 %v325_v51, %v288_v33  ;;  %v252_v32 = vrot.slane %v251_v57, 2  ;;  %v407_v51 = vadd.f32 %v406_v20, %v405_v26  ;;  %v263_v24 = vmax.f32 %v248_v10, 1e-12 }
 0x1d8   :  { %v315_v13 = vpop.xlane.xlu0 %314 }
 0x1d9   :  { %v327_v25 = vmul.f32 0.16666667, %v315_v13  ;;  %v338_v11 = vsel %vm337_vm8, %v331_v14, 0.0  ;;  %v414_v13 = vadd.f32 %v413_v5, %v412_v30  ;;  %v425_v7 = vmax.f32 %v407_v51, 1.0 }
 0x1da   :  { %v339_v58 = vrot.slane %v338_v11, 4 }
 0x1db   :  { %v333_v21 = vmul.f32 %v327_v25, %v290_v37  ;;  %v419_v37 = vadd.f32 %v418_v27, %v417_v15  ;;  %502 = vrcp.f32 %v425_v7 }
 0x1dc   :  { %v321_v17 = vpop.xlane.xlu0 %320  ;;  %v340_v33 = vadd.f32 %v339_v58, %v338_v11  ;;  %v426_v11 = vmax.f32 %v414_v13, 1.0 }
 0x1dd   :  { %v329_v54 = vmul.f32 0.16666667, %v321_v17  ;;  %v352_v29 = vsel %vm337_vm8, %v333_v21, 0.0  ;;  %v420_v52 = vrot.slane %v419_v37, 1 }
 0x1de   :  { %v353_v41 = vrot.slane %v352_v29, 4  ;;  %v341_v48 = vrot.slane %v340_v33, 2  ;;  %504 = vrcp.f32 %v426_v11 }
 0x1df   :  { %v335_v31 = vmul.f32 %v329_v54, %v292_v44  ;;  %v253_v44 = vadd.f32 %v252_v32, %v251_v57  ;;  %v421_v1 = vadd.f32 %v420_v52, %v419_v37 }
 0x1e0   :  { %v354_v56 = vadd.f32 %v353_v41, %v352_v29  ;;  %v342_v63 = vadd.f32 %v341_v48, %v340_v33  ;;  %v162_v8 = vpop.xlane.xlu0 %161 }
 0x1e1   :  { %v366_v45 = vsel %vm337_vm8, %v335_v31, 0.0  ;;  %v254_v0 = vrot.slane %v253_v44, 1  ;;  %v427_v54 = vmax.f32 %v421_v1, 1.0  ;;  %v497_v31 = vpop.eup %496  ;;  %v178_v37 = vsub.f32 0.0, %v162_v8 }
 0x1e2   :  { %v367_v59 = vrot.slane %v366_v45, 4  ;;  %v355_v25 = vrot.slane %v354_v56, 2  ;;  %v343_v16 = vrot.slane %v342_v63, 1  ;;  %v499_v55 = vpop.eup %498 }
 0x1e3   :  { %v255_v21 = vadd.f32 %v254_v0, %v253_v44  ;;  %506 = vrcp.f32 %v427_v54  ;;  %v501_v13 = vpop.eup %500 }
 0x1e4   :  { %v368_v4 = vadd.f32 %v367_v59, %v366_v45  ;;  %v356_v23 = vadd.f32 %v355_v25, %v354_v56  ;;  %v344_v28 = vadd.f32 %v343_v16, %v342_v63  ;;  %v168_v19 = vpop.xlane.xlu0 %167  ;;  %508 = vrcp.f32 %v263_v24 }
 0x1e5   :  { %v264_v2 = vmax.f32 %v255_v21, 1e-12  ;;  %v180_v48 = vsub.f32 0.0, %v168_v19 }
 0x1e6   :  { %v369_v58 = vrot.slane %v368_v4, 2  ;;  %v357_v36 = vrot.slane %v356_v23, 1  ;;  %v429_v45 = vmul.f32 %v497_v31, %v344_v28 }
 0x1e7   :  { %510 = vrcp.f32 %v264_v2  ;;  %v217_v1 = vmul.f32 %v773_v40, %v180_v48 }
 0x1e8   :  { %v370_v20 = vadd.f32 %v369_v58, %v368_v4  ;;  %v358_v56 = vadd.f32 %v357_v36, %v356_v23  ;;  %v441_v7 = vsel %vm440_vm9, %v429_v45, 0.0 }
 0x1ea   :  { %v371_v59 = vrot.slane %v370_v20, 1 }
 0x205   :  { %v797_v46 = vpop.xlane.xlu1 %213 }
 0x206   :  { %v256_v49 = vadd.f32 %v797_v46, %v760_v35 }
 0x208   :  { %v257_v60 = vrot.slane %v256_v49, 4 }
 0x209   :  { %v312_v62 = vpop.xlane.xlu1 %311 }
 0x20a   :  { %v258_v14 = vadd.f32 %v257_v60, %v256_v49  ;;  %v326_v3 = vmul.f32 0.16666667, %v312_v62  ;;  %v174_v60 = vpop.xlane.xlu0 %173 }
 0x20b   :  { %v182_v8 = vsub.f32 0.0, %v174_v60 }
 0x20c   :  { %v332_v6 = vmul.f32 %v326_v3, %v758_v9  ;;  %v259_v12 = vrot.slane %v258_v14, 2 }
 0x20d   :  { %v318_v15 = vpop.xlane.xlu1 %317 }
 0x20e   :  { %v345_v17 = vsel %vm337_vm8, %v332_v6, 0.0  ;;  %v328_v18 = vmul.f32 0.16666667, %v318_v15  ;;  %v260_v26 = vadd.f32 %v259_v12, %v258_v14  ;;  %v433_v12 = vmul.f32 %v501_v13, %v358_v56 }
 0x20f   :  { %v346_v22 = vrot.slane %v345_v17, 4  ;;  %v372_v15 = vadd.f32 %v371_v59, %v370_v20 }
 0x210   :  { %v334_v57 = vmul.f32 %v328_v18, %v771_v39  ;;  %v261_v38 = vrot.slane %v260_v26, 1  ;;  %v444_v19 = vsel %vm440_vm9, %v433_v12, 0.0 }
 0x211   :  { %v347_v9 = vadd.f32 %v346_v22, %v345_v17  ;;  %v324_v27 = vpop.xlane.xlu1 %323 }
 0x212   :  { %v359_v29 = vsel %vm337_vm8, %v334_v57, 0.0  ;;  %v330_v30 = vmul.f32 0.16666667, %v324_v27  ;;  %v262_v62 = vadd.f32 %v261_v38, %v260_v26  ;;  %v219_v26 = vmul.f32 %v760_v35, %v182_v8 }
 0x213   :  { %v348_v33 = vrot.slane %v347_v9, 2  ;;  %v360_v32 = vrot.slane %v359_v29, 4 }
 0x214   :  { %v336_v39 = vmul.f32 %v330_v30, %v783_v47  ;;  %v215_v47 = vmul.f32 %v753_v34, %v178_v37  ;;  %v503_v34 = vpop.eup %502  ;;  %v265_v17 = vmax.f32 %v262_v62, 1e-12 }
 0x215   :  { %v349_v41 = vadd.f32 %v348_v33, %v347_v9  ;;  %v361_v42 = vadd.f32 %v360_v32, %v359_v29  ;;  %v165_v5 = vpop.xlane.xlu1 %164  ;;  %v505_v23 = vpop.eup %504 }
 0x216   :  { %v373_v49 = vsel %vm337_vm8, %v336_v39, 0.0  ;;  %v179_v44 = vsub.f32 0.0, %v165_v5  ;;  %v507_v28 = vpop.eup %506  ;;  %v437_v31 = vmul.f32 %v505_v23, %v372_v15  ;;  %512 = vrcp.f32 %v265_v17 }
 0x217   :  { %v350_v50 = vrot.slane %v349_v41, 1  ;;  %v362_v51 = vrot.slane %v361_v42, 2  ;;  %v374_v52 = vrot.slane %v373_v49, 4  ;;  %v509_v35 = vpop.eup %508 }
 0x218   :  { %v216_v61 = vmul.f32 %v750_v43, %v179_v44  ;;  %v511_v38 = vpop.eup %510  ;;  %v447_v5 = vsel %vm440_vm9, %v437_v31, 0.0 }
 0x219   :  { %v351_v63 = vadd.f32 %v350_v50, %v349_v41  ;;  %v363_v14 = vadd.f32 %v362_v51, %v361_v42  ;;  %v375_v3 = vadd.f32 %v374_v52, %v373_v49  ;;  %v171_v0 = vpop.xlane.xlu1 %170 }
 0x21a   :  { %v221_v25 = vadd.f32 %v216_v61, %v215_v47  ;;  %v181_v4 = vsub.f32 0.0, %v171_v0 }
 0x21b   :  { %v431_v6 = vmul.f32 %v499_v55, %v351_v63  ;;  %v364_v10 = vrot.slane %v363_v14, 1  ;;  %v376_v11 = vrot.slane %v375_v3, 2 }
 0x21c   :  { %v222_v43 = vrot.slane %v221_v25, 4  ;;  %v218_v16 = vmul.f32 %v786_v53, %v181_v4 }
 0x21d   :  { %v442_v18 = vsel %vm440_vm9, %v431_v6, 0.0  ;;  %v365_v21 = vadd.f32 %v364_v10, %v363_v14  ;;  %v377_v22 = vadd.f32 %v376_v11, %v375_v3  ;;  %v177_v54 = vpop.xlane.xlu1 %176 }
 0x21e   :  { %v443_v40 = vadd.f32 %v442_v18, %v441_v7  ;;  %v223_v58 = vadd.f32 %v222_v43, %v221_v25  ;;  %v228_v57 = vadd.f32 %v218_v16, %v217_v1  ;;  %v183_v24 = vsub.f32 0.0, %v177_v54 }
 0x21f   :  { %v435_v9 = vmul.f32 %v503_v34, %v365_v21  ;;  %v378_v27 = vrot.slane %v377_v22, 1 }
 0x220   :  { %450 = vst.msk [vmem:[%s849_s7] sm:$0x1] %vm272_vm10, %v443_v40  ;;  %v224_v53 = vrot.slane %v223_v58, 2  ;;  %v229_v29 = vrot.slane %v228_v57, 4  ;;  %v220_v30 = vmul.f32 %v797_v46, %v183_v24 }
 0x221   :  { %v445_v2 = vsel %vm440_vm9, %v435_v9, 0.0  ;;  %v379_v33 = vadd.f32 %v378_v27, %v377_v22 }
 0x222   :  { %v446_v32 = vadd.f32 %v445_v2, %v444_v19  ;;  %v225_v36 = vadd.f32 %v224_v53, %v223_v58  ;;  %v230_v20 = vadd.f32 %v229_v29, %v228_v57  ;;  %v235_v37 = vadd.f32 %v220_v30, %v219_v26 }
 0x223   :  { %v439_v39 = vmul.f32 %v507_v28, %v379_v33  ;;  %v513_v61 = vpop.eup %512 }
 0x224   :  { %451 = vst.msk [vmem:[%s849_s7 + $0x1] sm:$0x1] %vm272_vm10, %v446_v32  ;;  %v226_v41 = vrot.slane %v225_v36, 1  ;;  %v231_v42 = vrot.slane %v230_v20, 2  ;;  %v236_v46 = vrot.slane %v235_v37, 4 }
 0x225   :  { %v448_v45 = vsel %vm440_vm9, %v439_v39, 0.0 }
 0x226   :  { %v449_v48 = vadd.f32 %v448_v45, %v447_v5  ;;  %v227_v49 = vadd.f32 %v226_v41, %v225_v36  ;;  %v232_v44 = vadd.f32 %v231_v42, %v230_v20  ;;  %v237_v50 = vadd.f32 %v236_v46, %v235_v37 }
 0x228   :  { %452 = vst.msk [vmem:[%s849_s7 + $0x2] sm:$0x1] %vm272_vm10, %v449_v48  ;;  %v267_v51 = vmul.f32 %v509_v35, %v227_v49  ;;  %v233_v52 = vrot.slane %v232_v44, 1  ;;  %v238_v55 = vrot.slane %v237_v50, 2 }
 0x22a   :  { %273 = vst.msk [vmem:[%s850_s6] sm:$0x1] %vm272_vm10, %v267_v51  ;;  %v234_v56 = vadd.f32 %v233_v52, %v232_v44  ;;  %v239_v59 = vadd.f32 %v238_v55, %v237_v50 }
 0x22c   :  { %v269_v47 = vmul.f32 %v511_v38, %v234_v56  ;;  %v240_v60 = vrot.slane %v239_v59, 1 }
 0x22e   :  { %274 = vst.msk [vmem:[%s850_s6 + $0x1] sm:$0x1] %vm272_vm10, %v269_v47  ;;  %v241_v13 = vadd.f32 %v240_v60, %v239_v59 }
 0x230   :  { %v271_v62 = vmul.f32 %v513_v61, %v241_v13 }
 0x232   :  { %275 = vst.msk [vmem:[%s850_s6 + $0x2] sm:$0x1] %vm272_vm10, %v271_v62 }

</bundles_post_ra>
